<compile_context>
chip_gen: v7x
topology: tpu7x:2x2x1
jax: 0.10.0
libtpu: 0.0.40
codegen_flags: <defaults>
</compile_context>

<pallas_src>
import math

import jax
import jax.numpy as jnp
from jax import lax
from jax.experimental import pallas as pl
from jax.experimental.pallas import tpu as pltpu

_INV_SQRT2 = 1.0 / math.sqrt(2.0)


def bert_intermediate_kernel(x_ref, w_ref, b_ref, o_ref):
    # x_ref: (tm, H)   w_ref: (H, tn)   b_ref: (1, tn)   o_ref: (tm, tn)
    # Native-dtype operands straight into the MXU, f32 accumulation.
    y = jnp.dot(x_ref[...], w_ref[...], preferred_element_type=jnp.float32)
    y = y + b_ref[...].astype(jnp.float32)
    # Exact (erf-based) GELU — parity with PyTorch's default nn.GELU ("gelu").
    # TODO(synk): if model parity allows, approximate=True (tanh) would move the
    # transcendental to the otherwise-idle EUP slot on v6e/v7x.
    y = 0.5 * y * (1.0 + lax.erf(y * _INV_SQRT2))
    o_ref[...] = y.astype(o_ref.dtype)


def _round_up(x, m):
    return (x + m - 1) // m * m


def _vmem_capacity_bytes():
    """Physical VMEM per TensorCore (64 MiB on v7x, 128 MiB on v5e/v6e)."""
    try:
        return int(pltpu.get_tpu_info().vmem_capacity_bytes)
    except Exception:
        return 128 * 1024 * 1024


def _pick_tm(M, tm_max):
    """Row-tile size.  Full extent for small M (block dim == array dim is always
    layout-legal), otherwise >= 2 tiles so both v7x TensorCores get work."""
    if M <= 256:
        return M
    if M <= tm_max:
        return min(tm_max, _round_up(-(-M // 2), 16))
    return tm_max


def _pick_tn(I, tn_default):
    """Largest lane-dense (multiple of 128) tile of the intermediate dim dividing I."""
    if I <= tn_default or I % 128 != 0:
        return I
    tn = (tn_default // 128) * 128
    while tn >= 128:
        if I % tn == 0:
            return tn
        tn -= 128
    return I


def _block_spec(shape, index_map, buffers=None):
    """BlockSpec with optional pipeline buffer count (falls back gracefully)."""
    if buffers is not None:
        try:
            return pl.BlockSpec(shape, index_map, pipeline_mode=pl.Buffered(buffers))
        except (TypeError, AttributeError):
            pass
    return pl.BlockSpec(shape, index_map)


def bert_intermediate(hidden_states, weight, bias, *, tm_max=512, tn_fallback=512,
                      force_column_tiles=False):
    """hidden_states: (..., H); weight: (H, I) [i.e. torch nn.Linear weight.T];
    bias: (I,).  Returns GELU(hidden_states @ weight + bias) with shape (..., I)."""
    *lead, H = hidden_states.shape
    if weight.shape[0] != H:
        raise ValueError(
            f"weight must be laid out (hidden={H}, intermediate), got {weight.shape}; "
            "pass the transposed torch nn.Linear weight (torch stores (out, in)).")
    I = weight.shape[1]
    M = 1
    for d in lead:
        M *= d

    x2d = hidden_states.reshape(M, H)
    b2d = bias.reshape(1, I)

    x_bytes = x2d.dtype.itemsize
    w_bytes = weight.dtype.itemsize
    o_bytes = x_bytes

    tm = _pick_tm(M, tm_max)
    grid_m = pl.cdiv(M, tm)

    cap = _vmem_capacity_bytes()
    budget = int(cap * 0.70)  # fit decision leaves headroom for compiler scratch

    # Resident-weight working set: weight+bias single-buffered, x/out double-buffered.
    resident_need = (H * I + I) * w_bytes + 2 * tm * (H * x_bytes + I * o_bytes)
    use_resident = (not force_column_tiles) and resident_need <= budget

    cost = pl.CostEstimate(
        flops=2 * M * H * I,
        transcendentals=M * I,
        bytes_accessed=(M * H) * x_bytes + (H * I + I) * w_bytes + (M * I) * o_bytes,
    )

    if use_resident:
        # 1-D row grid; weight/bias index maps are constant -> DMA'd once.
        grid = (grid_m,)
        in_specs = [
            pl.BlockSpec((tm, H), lambda i: (i, 0)),
            _block_spec((H, I), lambda i: (0, 0), buffers=1),
            _block_spec((1, I), lambda i: (0, 0), buffers=1),
        ]
        out_specs = pl.BlockSpec((tm, I), lambda i: (i, 0))
        dim_sem = ("parallel",)
        need = resident_need
    else:
        # Column-tiled fallback: intermediate-dim axis outermost so the (H, tn)
        # weight panel is fetched once per column tile (constant across the
        # inner row sweep), not once per row tile.
        tn = _pick_tn(I, tn_fallback)
        grid = (I // tn, grid_m)
        in_specs = [
            pl.BlockSpec((tm, H), lambda j, i: (i, 0)),
            pl.BlockSpec((H, tn), lambda j, i: (0, j)),
            pl.BlockSpec((1, tn), lambda j, i: (0, j)),
        ]
        out_specs = pl.BlockSpec((tm, tn), lambda j, i: (i, j))
        dim_sem = ("parallel", "parallel")
        need = 2 * (tm * H * x_bytes + (H + 1) * tn * w_bytes + tm * tn * o_bytes)

    # VMEM limit: enough for the working set + headroom, capped well under the
    # physical capacity of the current generation (v7x: ~54 MiB; v5e/v6e: ~108 MiB).
    vmem_limit = min(int(cap * 0.85), max(need + (8 << 20), 32 << 20))
    vmem_limit = max(vmem_limit, need + (2 << 20))
    vmem_limit = min(vmem_limit, int(cap * 0.90))

    out = pl.pallas_call(
        bert_intermediate_kernel,
        out_shape=jax.ShapeDtypeStruct((M, I), hidden_states.dtype),
        grid_spec=pltpu.PrefetchScalarGridSpec(
            num_scalar_prefetch=0,
            grid=grid,
            in_specs=in_specs,
            out_specs=out_specs,
        ),
        compiler_params=pltpu.CompilerParams(
            dimension_semantics=dim_sem,
            vmem_limit_bytes=int(vmem_limit),
        ),
        cost_estimate=cost,
    )(x2d, weight, b2d)

    return out.reshape(*lead, I)


def reference(hidden_states, weight, bias):
    y = jnp.einsum("...h,hi->...i", hidden_states, weight) + bias
    return jax.nn.gelu(y, approximate=False)


if __name__ == "__main__":
    key = jax.random.PRNGKey(0)

    # Small shapes consistent with BertIntermediate: batch=2, seq=8,
    # hidden_size=32, intermediate_size=64.
    B, S, H, I = 2, 8, 32, 64
    kx, kw, kb, kx2, kx3 = jax.random.split(key, 5)

    x = jax.random.normal(kx, (B, S, H), dtype=jnp.float32)
    # nn.Linear(hidden, intermediate) stores weight as (I, H) in torch; we keep
    # the transposed (H, I) layout so the kernel computes x @ W + b on the MXU.
    w = jax.random.normal(kw, (H, I), dtype=jnp.float32) * (1.0 / math.sqrt(H))
    b = jax.random.normal(kb, (I,), dtype=jnp.float32) * 0.02

    out = jax.block_until_ready(bert_intermediate(x, w, b))
    assert out.shape == (B, S, I)
    assert jnp.allclose(out, reference(x, w, b), atol=1e-5, rtol=1e-5), "mismatch (f32)"

    # Ragged rows (B*S = 15, not a sublane multiple) -> single full-extent tile.
    x2 = jax.random.normal(kx2, (3, 5, H), dtype=jnp.float32)
    out2 = jax.block_until_ready(bert_intermediate(x2, w, b))
    assert out2.shape == (3, 5, I)
    assert jnp.allclose(out2, reference(x2, w, b), atol=1e-5, rtol=1e-5), "mismatch (ragged)"

    # Multi-row-tile case with a masked boundary block (M=300 -> tm=160, 2 tiles);
    # exercises the no-pad / no-slice boundary handling.
    x3 = jax.random.normal(kx3, (4, 75, H), dtype=jnp.float32)
    out3 = jax.block_until_ready(bert_intermediate(x3, w, b))
    assert out3.shape == (4, 75, I)
    assert jnp.allclose(out3, reference(x3, w, b), atol=1e-5, rtol=1e-5), "mismatch (boundary)"

    # Column-tiled fallback path (used when the weight panel cannot stay
    # VMEM-resident, e.g. very large f32 intermediate dims) — exercised explicitly.
    out4 = jax.block_until_ready(bert_intermediate(x, w, b, force_column_tiles=True))
    assert jnp.allclose(out4, reference(x, w, b), atol=1e-5, rtol=1e-5), "mismatch (fallback)"

    print("KERNEL_OK")
</pallas_src>

<mosaic_0001>
module attributes {stable_mosaic.version = 11 : i64} {
  func.func @bert_intermediate_kernel(%arg0: i32, %arg1: memref<16x32xf32, #tpu.memory_space<vmem>>, %arg2: memref<32x64xf32, #tpu.memory_space<vmem>>, %arg3: memref<1x64xf32, #tpu.memory_space<vmem>>, %arg4: memref<16x64xf32, #tpu.memory_space<vmem>>) attributes {dimension_semantics = [#tpu.dimension_semantics<parallel>], iteration_bounds = array<i64: 1>, scalar_prefetch = 0 : i64, scratch_operands = 0 : i64, tpu.core_type = #tpu.core_type<tc>, window_params = [{transform_indices = @transform_0, window_bounds = array<i64: 16, 32>}, {pipeline_mode = #tpu.pipeline_mode<synchronous>, transform_indices = @transform_1, window_bounds = array<i64: 32, 64>}, {pipeline_mode = #tpu.pipeline_mode<synchronous>, transform_indices = @transform_2, window_bounds = array<i64: 1, 64>}, {transform_indices = @transform_3, window_bounds = array<i64: 16, 64>}]} {
    %c0 = arith.constant 0 : index
    %c0_0 = arith.constant 0 : index
    %0 = vector.load %arg1[%c0, %c0_0] : memref<16x32xf32, #tpu.memory_space<vmem>>, vector<16x32xf32>
    %c0_1 = arith.constant 0 : index
    %c0_2 = arith.constant 0 : index
    %1 = vector.load %arg2[%c0_1, %c0_2] : memref<32x64xf32, #tpu.memory_space<vmem>>, vector<32x64xf32>
    %cst = arith.constant dense<0.000000e+00> : vector<16x64xf32>
    %2 = tpu.matmul %0, %1, %cst {dimension_numbers = #tpu.dot_dimension_numbers<[1], [0], [0], [1], [0, 0, 1, 1], [], []>} : vector<16x32xf32>, vector<32x64xf32>, vector<16x64xf32> -> vector<16x64xf32>
    %c0_3 = arith.constant 0 : index
    %c0_4 = arith.constant 0 : index
    %3 = vector.load %arg3[%c0_3, %c0_4] : memref<1x64xf32, #tpu.memory_space<vmem>>, vector<1x64xf32>
    %4 = vector.broadcast %3 : vector<1x64xf32> to vector<16x64xf32>
    %5 = arith.addf %2, %4 : vector<16x64xf32>
    %cst_5 = arith.constant 5.000000e-01 : f32
    %6 = vector.broadcast %cst_5 : f32 to vector<16x64xf32>
    %7 = arith.mulf %6, %5 : vector<16x64xf32>
    %cst_6 = arith.constant 0.707106769 : f32
    %8 = vector.broadcast %cst_6 : f32 to vector<16x64xf32>
    %9 = arith.mulf %5, %8 : vector<16x64xf32>
    %10 = math.erf %9 : vector<16x64xf32>
    %cst_7 = arith.constant 1.000000e+00 : f32
    %11 = vector.broadcast %cst_7 : f32 to vector<16x64xf32>
    %12 = arith.addf %11, %10 : vector<16x64xf32>
    %13 = arith.mulf %7, %12 : vector<16x64xf32>
    %c0_8 = arith.constant 0 : index
    %c0_9 = arith.constant 0 : index
    %14 = vector.load %arg4[%c0_8, %c0_9] : memref<16x64xf32, #tpu.memory_space<vmem>>, vector<16x64xf32>
    tpu.vector_store %arg4[%c0_8, %c0_9], %13 {strides = array<i32>} : memref<16x64xf32, #tpu.memory_space<vmem>>, vector<16x64xf32>,
    return
  }
  func.func @transform_0(%arg0: i32) -> (i32, i32) {
    %c0_i32 = arith.constant 0 : i32
    %c0_i32_0 = arith.constant 0 : i32
    return %arg0, %c0_i32 : i32, i32
  }
  func.func @transform_1(%arg0: i32) -> (i32, i32) {
    %c0_i32 = arith.constant 0 : i32
    %c0_i32_0 = arith.constant 0 : i32
    %c0_i32_1 = arith.constant 0 : i32
    return %c0_i32, %c0_i32_0 : i32, i32
  }
  func.func @transform_2(%arg0: i32) -> (i32, i32) {
    %c0_i32 = arith.constant 0 : i32
    %c0_i32_0 = arith.constant 0 : i32
    %c0_i32_1 = arith.constant 0 : i32
    return %c0_i32, %c0_i32_0 : i32, i32
  }
  func.func @transform_3(%arg0: i32) -> (i32, i32) {
    %c0_i32 = arith.constant 0 : i32
    %c0_i32_0 = arith.constant 0 : i32
    return %arg0, %c0_i32 : i32, i32
  }
}

</mosaic_0001>

<bundles_post_ra>
// kernel: tpu_custom_call.1
= control target key start
LH: loop header
LB: loop body
LE: loop exit
PB: predicated region body
PF: predicated region fallthrough
CT: control target
= control target key end

     0   :  { %8 = vsyncpa [#allocation3], 0  ;;  %s351_s0 = inlined_call_operand.hbm [shape: f32[16,32], index: 0, kind: input, shape index: {}]   ;;  %s352_s1 = inlined_call_operand.hbm [shape: f32[32,64], index: 1, kind: input, shape index: {}]   ;;  %s353_s2 = inlined_call_operand.vmem [shape: f32[1,64], index: 2, kind: input, shape index: {}]   ;;  %s354_s3 = inlined_call_operand.hbm [shape: f32[16,64], index: 3, kind: output, shape index: {}]  }
   0x1   :  { %9 = vsyncpa [#allocation6], 0 }
   0x2   :  { %10 = vsyncpa [#allocation4], 0  ;;  %s278_s12 = smov [#allocation2]   ;;  %s206_s16 = scalar_lea.hbm %s351_s0, 256 }
   0x3   :  { %s16_s13 = sshll.u32 %s278_s12, 4  ;;  %p207_p0 = scmp.ne.s32.totalorder %s351_s0, %s206_s16  ;;  %s17_s13 = int_to_ptr.vmem [resolvable:$true] %s16_s13 }
   0x4   :  { %p210_p1 = scmp.lt.u32.totalorder %s206_s16, %s351_s0 }
   0x6   :  { %p212_p2 = pnand %p210_p1, %p207_p0 }
   0x8   :  { %215 = shalt.err (!%p212_p2)
}
   0x9   :  { %s216_s21 = scalar_lea.vmem %s17_s13, 256  ;;  %p221_p4 = scmp.lt.s32.totalorder %s17_s13, %s17_s13 }
   0xa   :  { %p217_p3 = scmp.ne.s32.totalorder %s17_s13, %s216_s21  ;;  %p222_p5 = scmp.lt.s32.totalorder %s216_s21, %s216_s21 }
   0xc   :  { %p223_p6 = por %p222_p5, %p221_p4 }
   0xe   :  { %p224_p7 = pnand %p223_p6, %p217_p3 }
  0x10   :  { %227 = shalt.err (!%p224_p7)
}
  0x11   :  { %s279_s22 = smov 128   ;;  %s280_s23 = smov 8  }
  0x12   :  { %22 = dma.hbm_to_vmem [thread:$0]  %s351_s0, 256, %s17_s13, [#allocation3], %s279_s22, %s279_s22, %s280_s23  }
  0x13   :  { %s281_s26 = smov [#allocation5]   ;;  %s228_s30 = scalar_lea.hbm %s352_s1, 512 }
  0x14   :  { %s28_s27 = sshll.u32 %s281_s26, 4  ;;  %p229_p8 = scmp.ne.s32.totalorder %s352_s1, %s228_s30  ;;  %s29_s27 = int_to_ptr.vmem [resolvable:$true] %s28_s27 }
  0x15   :  { %p232_p9 = scmp.lt.u32.totalorder %s228_s30, %s352_s1 }
  0x17   :  { %p234_p10 = pnand %p232_p9, %p229_p8 }
  0x19   :  { %237 = shalt.err (!%p234_p10)
}
  0x1a   :  { %s238_s8 = scalar_lea.vmem %s29_s27, 512  ;;  %p243_p12 = scmp.lt.s32.totalorder %s29_s27, %s29_s27 }
  0x1b   :  { %p239_p11 = scmp.ne.s32.totalorder %s29_s27, %s238_s8  ;;  %p244_p13 = scmp.lt.s32.totalorder %s238_s8, %s238_s8 }
  0x1d   :  { %p245_p0 = por %p244_p13, %p243_p12 }
  0x1f   :  { %p246_p1 = pnand %p245_p0, %p239_p11 }
  0x21   :  { %249 = shalt.err (!%p246_p1)
}
  0x22   :  { %34 = dma.hbm_to_vmem [thread:$0]  %s352_s1, 512, %s29_s27, [#allocation6], %s279_s22, %s279_s22, %s280_s23  }
  0x23   :  { %272 = dma.done.wait [#allocation3], 256  }
  0x24   :  { %273 = vsyncadd [#allocation3], 4294967040 }
  0x25   :  { %274 = dma.done.wait [#allocation6], 512  }
  0x26   :  { %275 = vsyncadd [#allocation6], 4294966784  ;;  %vm56_vm0 = vcmask 261120   ;;  %v45_v0 = vld [vmem:[#allocation5] sm:$0xff]  ;;  %v46_v1 = vld [vmem:[#allocation5 + $0x8] sm:$0xff]  ;;  %s282_s11 = smov [#allocation7]  }
  0x27   :  { %v47_v2 = vld [vmem:[#allocation5 + $0x10] sm:$0xff]  ;;  %v189_v3 = vpack.c.bf16 %v46_v1, %v45_v0  ;;  %v48_v4 = vld [vmem:[#allocation5 + $0x18] sm:$0xff]  ;;  %s156_s12 = sshll.u32 %s282_s11, 4  ;;  %vm148_vm1 = vcmask 523264   ;;  %s157_s12 = int_to_ptr.vmem [resolvable:$true] %s156_s12 }
  0x28   :  { %v43_v5 = vld [vmem:[#allocation2] sm:$0xff]  ;;  %v193_v6 = vpack.c.bf16 %v48_v4, %v47_v2  ;;  %v44_v7 = vld [vmem:[#allocation2 + $0x8] sm:$0xff]  ;;  %p255_p3 = scmp.lt.s32.totalorder %s157_s12, %s157_s12 }
  0x29   :  { %186 = vmatprep.mubr.msk.f32.mxu0 %vm56_vm0, %v43_v5  ;;  %190 = vmatprep.subr.bf16.mxu0 %v189_v3  ;;  %v169_v8 = vld [vmem:[%s353_s2] ss:$0 sm:$0xff]  ;;  %s250_s2 = scalar_lea.vmem %s157_s12, 256 }
  0x2a   :  { %192 = vmatpush3.bf16.msra.mxu0 %v189_v3  ;;  %p251_p2 = scmp.ne.s32.totalorder %s157_s12, %s250_s2  ;;  %p256_p4 = scmp.lt.s32.totalorder %s250_s2, %s250_s2 }
  0x2b   :  { %194 = vmatprep.subr.bf16.mxu0 %v193_v6 }
  0x2c   :  { %p257_p5 = por %p256_p4, %p255_p3 }
  0x2e   :  { %196 = vmatpush3.bf16.msra.mxu0 %v193_v6  ;;  %p258_p6 = pnand %p257_p5, %p251_p2 }
  0x31   :  { %187 = vmatmul.mubr.msk.f32.vlgmr.msra.gmra.mrb[0].mxu0 %vm56_vm0, %v44_v7 }
 0x104   :  { %v188_v9 = vpop.f32.mrb[0].mxu0 }
 0x105   :  { %v135_v10 = vadd.f32 %v188_v9, %v169_v8  ;;  %v129_v11 = vpop.f32.mrb[1].mxu0 }
 0x106   :  { %v130_v12 = vadd.f32 %v169_v8, %v129_v11 }
 0x107   :  { %v141_v13 = vmul.f32 0.70710677, %v135_v10  ;;  %v139_v17 = vmul.f32 0.5, %v135_v10 }
 0x108   :  { %v140_v14 = vmul.f32 0.70710677, %v130_v12  ;;  %v138_v19 = vmul.f32 0.5, %v130_v12 }
 0x109   :  { %202 = verf.f32 %v141_v13 }
 0x10a   :  { %204 = verf.f32 %v140_v14 }
 0x113   :  { %v203_v15 = vpop.eup %202 }
 0x114   :  { %v205_v16 = vpop.eup %204  ;;  %v145_v18 = vadd.f32 1.0, %v203_v15 }
 0x115   :  { %v144_v20 = vadd.f32 1.0, %v205_v16 }
 0x116   :  { %v147_v21 = vmul.f32 %v145_v18, %v139_v17 }
 0x117   :  { %v146_v22 = vmul.f32 %v144_v20, %v138_v19 }
 0x118   :  { %150 = vst.msk [vmem:[#allocation7 + $0x8] sm:$0xff] %vm148_vm1, %v147_v21 }
 0x119   :  { %149 = vst.msk [vmem:[#allocation7] sm:$0xff] %vm148_vm1, %v146_v22 }
 0x11a   :  { %261 = shalt.err (!%p258_p6)
}
 0x11b   :  { %s262_s15 = scalar_lea.hbm %s354_s3, 256 }
 0x11c   :  { %p263_p7 = scmp.ne.s32.totalorder %s354_s3, %s262_s15  ;;  %p266_p8 = scmp.lt.u32.totalorder %s262_s15, %s354_s3 }
 0x11e   :  { %p268_p9 = pnand %p266_p8, %p263_p7 }
 0x120   :  { %271 = shalt.err (!%p268_p9)
}
 0x121   :  { %162 = dma.vmem_to_hbm [thread:$0]  %s157_s12, 256, %s354_s3, [#allocation4], %s279_s22, %s279_s22, %s280_s23  }
 0x122   :  { %276 = dma.done.wait [#allocation4], 256  }
 0x123   :  { %277 = vsyncadd [#allocation4], 4294967040 }
 0x124   :  { %166 = vsyncpa [#allocation3], 1 }
 0x125   :  { %167 = vsyncpa [#allocation6], 1 }
 0x126   :  { %168 = vsyncpa [#allocation4], 1 }

</bundles_post_ra>
